<compile_context>
chip_gen: v7x
topology: tpu7x:2x2x1
jax: 0.10.0
libtpu: 0.0.40
codegen_flags: <defaults>
</compile_context>

<pallas_src>
import jax
import jax.numpy as jnp
from jax.experimental import pallas as pl
from jax.experimental.pallas import tpu as pltpu

LN_EPS = 1e-5


def _round_up(x: int, m: int) -> int:
    return ((x + m - 1) // m) * m


def make_actor_kernel(hidden_layers: int, compute_dtype=jnp.bfloat16):
    """Build a fused kernel for a (static) number of hidden layers."""
    assert hidden_layers >= 1, "SimpleActor requires hidden_layers >= 1"
    n_extra = hidden_layers - 1
    cd = compute_dtype

    def kernel(x_ref, w1_ref, rows_ref, *rest):
        wh_refs = rest[:n_extra]
        w_out_ref, b_out_ref, mu_ref = rest[n_extra:]

        # Merged (1, hidden) row vectors: [b1, ln_gamma, ln_beta, bh_0, ...] (f32).
        rows = rows_ref[...]

        # --- Linear(obs_dim -> hidden): bf16 operands, f32 MXU accumulation ---
        h = jnp.dot(x_ref[...], w1_ref[...],
                    preferred_element_type=jnp.float32) + rows[0:1, :]

        # --- LayerNorm(hidden): two-pass stats in f32 (no E[x^2]-mean^2 cancel) ---
        inv_n = jnp.float32(1.0 / h.shape[-1])
        mean = jnp.sum(h, axis=-1, keepdims=True) * inv_n
        c = h - mean
        var = jnp.sum(c * c, axis=-1, keepdims=True) * inv_n
        hb = (c * jax.lax.rsqrt(var + LN_EPS)).astype(cd)

        # --- affine + Tanh in bf16 (EUP/VPU bf16 on v6e/v7x; feeds bf16 matmuls) ---
        hb = hb * rows[1:2, :].astype(cd) + rows[2:3, :].astype(cd)
        hb = jnp.tanh(hb)

        # --- extra [Linear -> ReLU] blocks (hidden_layers - 1 of them) ---
        for i in range(n_extra):
            acc = jnp.dot(hb, wh_refs[i][...],
                          preferred_element_type=jnp.float32) + rows[3 + i:4 + i, :]
            hb = jnp.maximum(acc, 0.0).astype(cd)

        # --- Linear(hidden -> action_dim_padded) + tanh; mu only ---
        out = jnp.dot(hb, w_out_ref[...],
                      preferred_element_type=jnp.float32) + b_out_ref[...]
        mu_ref[...] = jnp.tanh(out)

    return kernel


def simple_actor_forward(obs, std, params, hidden_layers: int = 1,
                         compute_dtype=jnp.bfloat16, tile_b: int | None = None):
    """Returns (mu, std) of the TruncatedNormal the PyTorch module would build."""
    assert hidden_layers >= 1, "SimpleActor requires hidden_layers >= 1"
    B, obs_dim = obs.shape
    hidden_dim = params["w1"].shape[1]
    action_dim = params["w_out"].shape[1]
    act_pad = _round_up(action_dim, 128)          # lane-dense output slab

    cd = compute_dtype
    cd_itemsize = jnp.dtype(cd).itemsize
    f32 = jnp.float32
    # Sub-32-bit obs packs along sublanes -> batch tile multiple of 16 for bf16.
    row_mult = max(8, 32 // cd_itemsize)

    # Batch tile: single step for small batches; for large batches 512-1024 rows
    # per step, capped at ceil(B/2) so there are >= 2 grid steps for CORE_PARALLEL.
    if tile_b is None:
        if B <= 512:
            tile_b = _round_up(B, row_mult)
        else:
            tile_b = min(1024, _round_up(pl.cdiv(B, 2), row_mult))
    tile_b = _round_up(tile_b, row_mult)
    b_pad = _round_up(B, tile_b)

    # Stream obs as bf16: halves the only per-grid-step DMA, no in-kernel cast.
    obs_p = obs.astype(cd)
    if b_pad != B:
        obs_p = jnp.pad(obs_p, ((0, b_pad - B), (0, 0)))

    w1 = params["w1"].astype(cd)
    w_out = params["w_out"].astype(cd)
    b_out = params["b_out"].astype(f32)
    if act_pad != action_dim:                     # zero pad -> tanh(0)=0, sliced off below
        w_out = jnp.pad(w_out, ((0, 0), (0, act_pad - action_dim)))
        b_out = jnp.pad(b_out, ((0, 0), (0, act_pad - action_dim)))

    # Merge all (1, hidden) row vectors into one array: one DMA + one VMEM buffer
    # instead of 3 + n_extra separate sublane-padded ones.
    row_list = [params["b1"], params["ln_w"], params["ln_b"]]
    wh = []
    for i in range(hidden_layers - 1):
        wh.append(params[f"wh{i}"].astype(cd))
        row_list.append(params[f"bh{i}"])
    rows = jnp.concatenate(
        [r.reshape(1, hidden_dim).astype(f32) for r in row_list], axis=0)

    inputs = [obs_p, w1, rows] + wh + [w_out, b_out]

    def resident_spec(arr):
        # Constant index map -> DMA'd once, stays VMEM-resident across the grid.
        # Single buffer: no need to double-buffer data that never changes.
        shape = arr.shape
        idx = lambda i, _s=shape: (0,) * len(_s)
        try:
            return pl.BlockSpec(shape, idx, pipeline_mode=pl.Buffered(1))
        except (TypeError, AttributeError):
            return pl.BlockSpec(shape, idx)

    in_specs = [pl.BlockSpec((tile_b, obs_dim), lambda i: (i, 0))]
    in_specs += [resident_spec(a) for a in inputs[1:]]
    out_specs = pl.BlockSpec((tile_b, act_pad), lambda i: (i, 0))
    out_shape = jax.ShapeDtypeStruct((b_pad, act_pad), f32)

    # Generation-aware VMEM cap: leave ~1/8 headroom for compiler scratch
    # (~56 MiB on v7x's 64 MiB/TC, ~112 MiB on v5e/v6e's 128 MiB).
    try:
        vmem_cap = int(pltpu.get_tpu_info().vmem_capacity_bytes)
    except Exception:
        vmem_cap = 64 * 1024 * 1024
    vmem_cap = (vmem_cap // 8) * 7

    weight_bytes = sum(int(a.size) * a.dtype.itemsize for a in inputs[1:])  # single-buffered
    io_bytes = 2 * tile_b * obs_dim * cd_itemsize + 2 * tile_b * act_pad * 4
    act_bytes = 6 * tile_b * max(hidden_dim, act_pad) * 4
    vmem_bytes = int(min(vmem_cap,
                         max(16 * 1024 * 1024,
                             weight_bytes + io_bytes + act_bytes + (4 << 20))))

    grid_steps = b_pad // tile_b
    core_parallel = getattr(pltpu, "CORE_PARALLEL", "parallel")
    arbitrary = getattr(pltpu, "ARBITRARY", "arbitrary")
    # CORE_PARALLEL only pays off (and only makes sense) with >= 2 grid steps.
    dim_sem = (core_parallel if grid_steps >= 2 else arbitrary,)

    mu_full = pl.pallas_call(
        make_actor_kernel(hidden_layers, cd),
        out_shape=out_shape,
        grid=(grid_steps,),
        in_specs=in_specs,
        out_specs=out_specs,
        compiler_params=pltpu.CompilerParams(
            dimension_semantics=dim_sem,
            vmem_limit_bytes=vmem_bytes),
    )(*inputs)

    mu = mu_full[:B, :action_dim]
    # std does not depend on obs -> constant fill in the wrapper, not in the kernel.
    std_out = jnp.full((B, action_dim), std, dtype=f32)
    return mu, std_out


def init_params(key, obs_dim, action_dim, hidden_dim, hidden_layers: int = 1):
    """Deterministic synthetic parameter init (PyTorch-Linear-style uniform)."""
    params = {}

    def linear_init(k, fan_in, fan_out):
        kw, kb = jax.random.split(k)
        bound = 1.0 / jnp.sqrt(fan_in)
        w = jax.random.uniform(kw, (fan_in, fan_out), jnp.float32, -bound, bound)
        b = jax.random.uniform(kb, (1, fan_out), jnp.float32, -bound, bound)
        return w, b

    keys = jax.random.split(key, hidden_layers + 2)
    params["w1"], params["b1"] = linear_init(keys[0], obs_dim, hidden_dim)
    params["ln_w"] = jnp.ones((1, hidden_dim), jnp.float32)
    params["ln_b"] = jnp.zeros((1, hidden_dim), jnp.float32)
    for i in range(hidden_layers - 1):
        params[f"wh{i}"], params[f"bh{i}"] = linear_init(keys[1 + i], hidden_dim, hidden_dim)
    params["w_out"], params["b_out"] = linear_init(keys[-1], hidden_dim, action_dim)
    return params


def reference_forward(obs, std, params, hidden_layers: int = 1,
                      compute_dtype=jnp.bfloat16):
    """Plain-JAX reference mirroring the PyTorch forward with the same
    bf16-operand / f32-accumulate matmul and bf16-elementwise numerics as the kernel."""
    cd = compute_dtype
    h = jnp.dot(obs.astype(cd), params["w1"].astype(cd),
                preferred_element_type=jnp.float32) + params["b1"]
    mean = jnp.mean(h, axis=-1, keepdims=True)
    c = h - mean
    var = jnp.mean(c * c, axis=-1, keepdims=True)
    hb = (c * jax.lax.rsqrt(var + LN_EPS)).astype(cd)
    hb = hb * params["ln_w"].astype(cd) + params["ln_b"].astype(cd)
    hb = jnp.tanh(hb)
    for i in range(hidden_layers - 1):
        acc = jnp.dot(hb, params[f"wh{i}"].astype(cd),
                      preferred_element_type=jnp.float32) + params[f"bh{i}"]
        hb = jnp.maximum(acc, 0.0).astype(cd)
    mu = jnp.tanh(jnp.dot(hb, params["w_out"].astype(cd),
                          preferred_element_type=jnp.float32) + params["b_out"])
    return mu, jnp.full_like(mu, std)


if __name__ == "__main__":
    key = jax.random.PRNGKey(0)
    k_obs, k_par, k_obs2, k_par2 = jax.random.split(key, 4)
    std = 0.3

    # --- small-shape smoke test; hidden_layers=2 exercises the [Linear->ReLU] branch ---
    B, OBS_DIM, ACTION_DIM, HIDDEN_DIM = 2, 16, 8, 32
    HIDDEN_LAYERS = 2
    obs = jax.random.normal(k_obs, (B, OBS_DIM), jnp.float32)
    params = init_params(k_par, OBS_DIM, ACTION_DIM, HIDDEN_DIM, HIDDEN_LAYERS)

    mu, std_out = simple_actor_forward(obs, std, params, HIDDEN_LAYERS)
    jax.block_until_ready((mu, std_out))

    mu_ref, std_ref = reference_forward(obs, std, params, HIDDEN_LAYERS)
    assert mu.shape == (B, ACTION_DIM) and std_out.shape == (B, ACTION_DIM)
    assert jnp.allclose(mu, mu_ref, atol=2e-3, rtol=2e-3), "mu mismatch vs reference"
    assert jnp.allclose(std_out, std_ref), "std mismatch vs reference"

    # --- larger batch: exercises the multi-step grid / CORE_PARALLEL path ---
    B2 = 1536
    obs2 = jax.random.normal(k_obs2, (B2, OBS_DIM), jnp.float32)
    params2 = init_params(k_par2, OBS_DIM, ACTION_DIM, HIDDEN_DIM, 1)
    mu2, std2 = simple_actor_forward(obs2, std, params2, hidden_layers=1)
    jax.block_until_ready((mu2, std2))
    mu2_ref, _ = reference_forward(obs2, std, params2, 1)
    assert mu2.shape == (B2, ACTION_DIM) and std2.shape == (B2, ACTION_DIM)
    assert jnp.allclose(mu2, mu2_ref, atol=2e-3, rtol=2e-3), "mu mismatch (large batch)"

    print("KERNEL_OK")
</pallas_src>

<mosaic_0001>
module attributes {stable_mosaic.version = 11 : i64} {
  func.func @kernel(%arg0: i32, %arg1: memref<16x16xbf16, #tpu.memory_space<vmem>>, %arg2: memref<16x32xbf16, #tpu.memory_space<vmem>>, %arg3: memref<4x32xf32, #tpu.memory_space<vmem>>, %arg4: memref<32x32xbf16, #tpu.memory_space<vmem>>, %arg5: memref<32x128xbf16, #tpu.memory_space<vmem>>, %arg6: memref<1x128xf32, #tpu.memory_space<vmem>>, %arg7: memref<16x128xf32, #tpu.memory_space<vmem>>) attributes {dimension_semantics = [#tpu.dimension_semantics<arbitrary>], iteration_bounds = array<i64: 1>, scalar_prefetch = 0 : i64, scratch_operands = 0 : i64, tpu.core_type = #tpu.core_type<tc>, window_params = [{transform_indices = @transform_0, window_bounds = array<i64: 16, 16>}, {pipeline_mode = #tpu.pipeline_mode<synchronous>, transform_indices = @transform_1, window_bounds = array<i64: 16, 32>}, {pipeline_mode = #tpu.pipeline_mode<synchronous>, transform_indices = @transform_2, window_bounds = array<i64: 4, 32>}, {pipeline_mode = #tpu.pipeline_mode<synchronous>, transform_indices = @transform_3, window_bounds = array<i64: 32, 32>}, {pipeline_mode = #tpu.pipeline_mode<synchronous>, transform_indices = @transform_4, window_bounds = array<i64: 32, 128>}, {pipeline_mode = #tpu.pipeline_mode<synchronous>, transform_indices = @transform_5, window_bounds = array<i64: 1, 128>}, {transform_indices = @transform_6, window_bounds = array<i64: 16, 128>}]} {
    %c0 = arith.constant 0 : index
    %c0_0 = arith.constant 0 : index
    %0 = vector.load %arg3[%c0, %c0_0] : memref<4x32xf32, #tpu.memory_space<vmem>>, vector<4x32xf32>
    %c0_1 = arith.constant 0 : index
    %c0_2 = arith.constant 0 : index
    %1 = vector.load %arg1[%c0_1, %c0_2] : memref<16x16xbf16, #tpu.memory_space<vmem>>, vector<16x16xbf16>
    %c0_3 = arith.constant 0 : index
    %c0_4 = arith.constant 0 : index
    %2 = vector.load %arg2[%c0_3, %c0_4] : memref<16x32xbf16, #tpu.memory_space<vmem>>, vector<16x32xbf16>
    %cst = arith.constant dense<0.000000e+00> : vector<16x32xf32>
    %3 = tpu.matmul %1, %2, %cst {dimension_numbers = #tpu.dot_dimension_numbers<[1], [0], [0], [1], [0, 0, 1, 1], [], []>} : vector<16x16xbf16>, vector<16x32xbf16>, vector<16x32xf32> -> vector<16x32xf32>
    %4 = vector.extract_strided_slice %0 {offsets = [0, 0], sizes = [1, 32], strides = [1, 1]} : vector<4x32xf32> to vector<1x32xf32>
    %5 = vector.broadcast %4 : vector<1x32xf32> to vector<16x32xf32>
    %6 = arith.addf %3, %5 : vector<16x32xf32>
    %cst_5 = arith.constant dense<0.000000e+00> : vector<16xf32>
    %7 = vector.multi_reduction <add>, %6, %cst_5 [1] : vector<16x32xf32> to vector<16xf32>
    %8 = vector.shape_cast %7 : vector<16xf32> to vector<16x1xf32>
    %cst_6 = arith.constant 3.125000e-02 : f32
    %9 = vector.broadcast %cst_6 : f32 to vector<16x1xf32>
    %10 = arith.mulf %8, %9 : vector<16x1xf32>
    %11 = vector.broadcast %10 : vector<16x1xf32> to vector<16x32xf32>
    %12 = arith.subf %6, %11 : vector<16x32xf32>
    %13 = arith.mulf %12, %12 : vector<16x32xf32>
    %cst_7 = arith.constant dense<0.000000e+00> : vector<16xf32>
    %14 = vector.multi_reduction <add>, %13, %cst_7 [1] : vector<16x32xf32> to vector<16xf32>
    %15 = vector.shape_cast %14 : vector<16xf32> to vector<16x1xf32>
    %cst_8 = arith.constant 3.125000e-02 : f32
    %16 = vector.broadcast %cst_8 : f32 to vector<16x1xf32>
    %17 = arith.mulf %15, %16 : vector<16x1xf32>
    %cst_9 = arith.constant 9.99999974E-6 : f32
    %18 = vector.broadcast %cst_9 : f32 to vector<16x1xf32>
    %19 = arith.addf %17, %18 : vector<16x1xf32>
    %20 = math.rsqrt %19 : vector<16x1xf32>
    %21 = vector.broadcast %20 : vector<16x1xf32> to vector<16x32xf32>
    %22 = arith.mulf %12, %21 : vector<16x32xf32>
    %23 = arith.truncf %22 : vector<16x32xf32> to vector<16x32xbf16>
    %24 = vector.extract_strided_slice %0 {offsets = [1, 0], sizes = [1, 32], strides = [1, 1]} : vector<4x32xf32> to vector<1x32xf32>
    %25 = arith.truncf %24 : vector<1x32xf32> to vector<1x32xbf16>
    %26 = vector.broadcast %25 : vector<1x32xbf16> to vector<16x32xbf16>
    %27 = arith.mulf %23, %26 : vector<16x32xbf16>
    %28 = vector.extract_strided_slice %0 {offsets = [2, 0], sizes = [1, 32], strides = [1, 1]} : vector<4x32xf32> to vector<1x32xf32>
    %29 = arith.truncf %28 : vector<1x32xf32> to vector<1x32xbf16>
    %30 = vector.broadcast %29 : vector<1x32xbf16> to vector<16x32xbf16>
    %31 = arith.addf %27, %30 : vector<16x32xbf16>
    %32 = math.tanh %31 : vector<16x32xbf16>
    %c0_10 = arith.constant 0 : index
    %c0_11 = arith.constant 0 : index
    %33 = vector.load %arg4[%c0_10, %c0_11] : memref<32x32xbf16, #tpu.memory_space<vmem>>, vector<32x32xbf16>
    %cst_12 = arith.constant dense<0.000000e+00> : vector<16x32xf32>
    %34 = tpu.matmul %32, %33, %cst_12 {dimension_numbers = #tpu.dot_dimension_numbers<[1], [0], [0], [1], [0, 0, 1, 1], [], []>} : vector<16x32xbf16>, vector<32x32xbf16>, vector<16x32xf32> -> vector<16x32xf32>
    %35 = vector.extract_strided_slice %0 {offsets = [3, 0], sizes = [1, 32], strides = [1, 1]} : vector<4x32xf32> to vector<1x32xf32>
    %36 = vector.broadcast %35 : vector<1x32xf32> to vector<16x32xf32>
    %37 = arith.addf %34, %36 : vector<16x32xf32>
    %cst_13 = arith.constant 0.000000e+00 : f32
    %38 = vector.broadcast %cst_13 : f32 to vector<16x32xf32>
    %39 = arith.maximumf %37, %38 : vector<16x32xf32>
    %40 = arith.truncf %39 : vector<16x32xf32> to vector<16x32xbf16>
    %c0_14 = arith.constant 0 : index
    %c0_15 = arith.constant 0 : index
    %41 = vector.load %arg5[%c0_14, %c0_15] : memref<32x128xbf16, #tpu.memory_space<vmem>>, vector<32x128xbf16>
    %cst_16 = arith.constant dense<0.000000e+00> : vector<16x128xf32>
    %42 = tpu.matmul %40, %41, %cst_16 {dimension_numbers = #tpu.dot_dimension_numbers<[1], [0], [0], [1], [0, 0, 1, 1], [], []>} : vector<16x32xbf16>, vector<32x128xbf16>, vector<16x128xf32> -> vector<16x128xf32>
    %c0_17 = arith.constant 0 : index
    %c0_18 = arith.constant 0 : index
    %43 = vector.load %arg6[%c0_17, %c0_18] : memref<1x128xf32, #tpu.memory_space<vmem>>, vector<1x128xf32>
    %44 = vector.broadcast %43 : vector<1x128xf32> to vector<16x128xf32>
    %45 = arith.addf %42, %44 : vector<16x128xf32>
    %46 = math.tanh %45 : vector<16x128xf32>
    %c0_19 = arith.constant 0 : index
    %c0_20 = arith.constant 0 : index
    %47 = vector.load %arg7[%c0_19, %c0_20] : memref<16x128xf32, #tpu.memory_space<vmem>>, vector<16x128xf32>
    tpu.vector_store %arg7[%c0_19, %c0_20], %46 {strides = array<i32>} : memref<16x128xf32, #tpu.memory_space<vmem>>, vector<16x128xf32>,
    return
  }
  func.func @transform_0(%arg0: i32) -> (i32, i32) {
    %c0_i32 = arith.constant 0 : i32
    %c0_i32_0 = arith.constant 0 : i32
    return %arg0, %c0_i32 : i32, i32
  }
  func.func @transform_1(%arg0: i32) -> (i32, i32) {
    %c0_i32 = arith.constant 0 : i32
    %c0_i32_0 = arith.constant 0 : i32
    %c0_i32_1 = arith.constant 0 : i32
    return %c0_i32, %c0_i32_0 : i32, i32
  }
  func.func @transform_2(%arg0: i32) -> (i32, i32) {
    %c0_i32 = arith.constant 0 : i32
    %c0_i32_0 = arith.constant 0 : i32
    %c0_i32_1 = arith.constant 0 : i32
    return %c0_i32, %c0_i32_0 : i32, i32
  }
  func.func @transform_3(%arg0: i32) -> (i32, i32) {
    %c0_i32 = arith.constant 0 : i32
    %c0_i32_0 = arith.constant 0 : i32
    %c0_i32_1 = arith.constant 0 : i32
    return %c0_i32, %c0_i32_0 : i32, i32
  }
  func.func @transform_4(%arg0: i32) -> (i32, i32) {
    %c0_i32 = arith.constant 0 : i32
    %c0_i32_0 = arith.constant 0 : i32
    %c0_i32_1 = arith.constant 0 : i32
    return %c0_i32, %c0_i32_0 : i32, i32
  }
  func.func @transform_5(%arg0: i32) -> (i32, i32) {
    %c0_i32 = arith.constant 0 : i32
    %c0_i32_0 = arith.constant 0 : i32
    %c0_i32_1 = arith.constant 0 : i32
    return %c0_i32, %c0_i32_0 : i32, i32
  }
  func.func @transform_6(%arg0: i32) -> (i32, i32) {
    %c0_i32 = arith.constant 0 : i32
    %c0_i32_0 = arith.constant 0 : i32
    return %arg0, %c0_i32 : i32, i32
  }
}

</mosaic_0001>

<bundles_post_ra>
// kernel: tpu_custom_call.1
= control target key start
LH: loop header
LB: loop body
LE: loop exit
PB: predicated region body
PF: predicated region fallthrough
CT: control target
= control target key end

     0   :  { %11 = vsyncpa [#allocation3], 0  ;;  %s690_s0 = inlined_call_operand.hbm [shape: bf16[16,16], index: 0, kind: input, shape index: {}]   ;;  %s691_s1 = inlined_call_operand.hbm [shape: bf16[16,32], index: 1, kind: input, shape index: {}]   ;;  %s692_s2 = inlined_call_operand.vmem [shape: f32[4,32], index: 2, kind: input, shape index: {}]   ;;  %s693_s3 = inlined_call_operand.hbm [shape: bf16[32,32], index: 3, kind: input, shape index: {}]   ;;  %s694_s4 = inlined_call_operand.hbm [shape: bf16[32,128], index: 4, kind: input, shape index: {}]   ;;  %s695_s5 = inlined_call_operand.vmem [shape: f32[1,128], index: 5, kind: input, shape index: {}]   ;;  %s696_s6 = inlined_call_operand.hbm [shape: f32[16,128], index: 6, kind: output, shape index: {}]  }
   0x1   :  { %12 = vsyncpa [#allocation6], 0 }
   0x2   :  { %13 = vsyncpa [#allocation9], 0 }
   0x3   :  { %14 = vsyncpa [#allocation4], 0  ;;  %s533_s21 = smov [#allocation5]   ;;  %s534_s23 = smov [#allocation2]  }
   0x4   :  { %s32_s22 = sshll.u32 %s533_s21, 4  ;;  %s20_s24 = sshll.u32 %s534_s23, 4  ;;  %s33_s22 = int_to_ptr.vmem [resolvable:$true] %s32_s22  ;;  %s579_s24 = int_to_ptr.vmem [resolvable:$true] %s20_s24 }
   0x5   :  { %s415_s27 = scalar_lea.hbm %s691_s1, 128 }
   0x6   :  { %p416_p0 = scmp.ne.s32.totalorder %s691_s1, %s415_s27  ;;  %p419_p1 = scmp.lt.u32.totalorder %s415_s27, %s691_s1 }
   0x8   :  { %p421_p2 = pnand %p419_p1, %p416_p0 }
   0xa   :  { %424 = shalt.err (!%p421_p2)
}
   0xb   :  { %s425_s8 = scalar_lea.vmem %s33_s22, 128  ;;  %p430_p4 = scmp.lt.s32.totalorder %s33_s22, %s33_s22 }
   0xc   :  { %p426_p3 = scmp.ne.s32.totalorder %s33_s22, %s425_s8  ;;  %p431_p5 = scmp.lt.s32.totalorder %s425_s8, %s425_s8 }
   0xe   :  { %p432_p6 = por %p431_p5, %p430_p4 }
  0x10   :  { %p433_p7 = pnand %p432_p6, %p426_p3 }
  0x12   :  { %436 = shalt.err (!%p433_p7)
}
  0x13   :  { %s535_s9 = smov 64   ;;  %s536_s10 = smov 4  }
  0x14   :  { %38 = dma.hbm_to_vmem [thread:$0]  %s691_s1, 128, %s33_s22, [#allocation6], %s535_s9, %s535_s9, %s536_s10  }
  0x15   :  { %s437_s15 = scalar_lea.hbm %s690_s0, 128 }
  0x16   :  { %p438_p8 = scmp.ne.s32.totalorder %s690_s0, %s437_s15  ;;  %p441_p9 = scmp.lt.u32.totalorder %s437_s15, %s690_s0 }
  0x18   :  { %p443_p10 = pnand %p441_p9, %p438_p8 }
  0x1a   :  { %446 = shalt.err (!%p443_p10)
}
  0x1b   :  { %s447_s20 = scalar_lea.vmem %s579_s24, 128  ;;  %p452_p12 = scmp.lt.s32.totalorder %s579_s24, %s579_s24 }
  0x1c   :  { %p448_p11 = scmp.ne.s32.totalorder %s579_s24, %s447_s20  ;;  %p453_p13 = scmp.lt.s32.totalorder %s447_s20, %s447_s20 }
  0x1e   :  { %p454_p0 = por %p453_p13, %p452_p12 }
  0x20   :  { %p455_p1 = pnand %p454_p0, %p448_p11 }
  0x22   :  { %458 = shalt.err (!%p455_p1)
}
  0x23   :  { %26 = dma.hbm_to_vmem [thread:$0]  %s690_s0, 128, %s579_s24, [#allocation3], %s535_s9, %s535_s9, %s536_s10  }
  0x24   :  { %s537_s22 = smov [#allocation7]   ;;  %s538_s25 = smov [#allocation8]  }
  0x25   :  { %s46_s23 = sshll.u32 %s537_s22, 4  ;;  %s58_s26 = sshll.u32 %s538_s25, 4  ;;  %s47_s23 = int_to_ptr.vmem [resolvable:$true] %s46_s23  ;;  %s616_s26 = int_to_ptr.vmem [resolvable:$true] %s58_s26 }
  0x26   :  { %s459_s29 = scalar_lea.hbm %s693_s3, 256 }
  0x27   :  { %p460_p2 = scmp.ne.s32.totalorder %s693_s3, %s459_s29  ;;  %p463_p3 = scmp.lt.u32.totalorder %s459_s29, %s693_s3 }
  0x29   :  { %p465_p4 = pnand %p463_p3, %p460_p2 }
  0x2b   :  { %468 = shalt.err (!%p465_p4)
}
  0x2c   :  { %s469_s0 = scalar_lea.vmem %s47_s23, 256  ;;  %p474_p6 = scmp.lt.s32.totalorder %s47_s23, %s47_s23 }
  0x2d   :  { %p470_p5 = scmp.ne.s32.totalorder %s47_s23, %s469_s0  ;;  %p475_p7 = scmp.lt.s32.totalorder %s469_s0, %s469_s0 }
  0x2f   :  { %p476_p8 = por %p475_p7, %p474_p6 }
  0x31   :  { %p477_p9 = pnand %p476_p8, %p470_p5 }
  0x33   :  { %480 = shalt.err (!%p477_p9)
}
  0x34   :  { %52 = dma.hbm_to_vmem [thread:$0]  %s693_s3, 256, %s47_s23, [#allocation6], %s535_s9, %s535_s9, %s536_s10  }
  0x35   :  { %s481_s15 = scalar_lea.hbm %s694_s4, 256 }
  0x36   :  { %p482_p10 = scmp.ne.s32.totalorder %s694_s4, %s481_s15  ;;  %p485_p11 = scmp.lt.u32.totalorder %s481_s15, %s694_s4 }
  0x38   :  { %p487_p12 = pnand %p485_p11, %p482_p10 }
  0x3a   :  { %490 = shalt.err (!%p487_p12)
}
  0x3b   :  { %s491_s20 = scalar_lea.vmem %s616_s26, 256  ;;  %p496_p0 = scmp.lt.s32.totalorder %s616_s26, %s616_s26 }
  0x3c   :  { %p492_p13 = scmp.ne.s32.totalorder %s616_s26, %s491_s20  ;;  %p497_p1 = scmp.lt.s32.totalorder %s491_s20, %s491_s20 }
  0x3e   :  { %p498_p2 = por %p497_p1, %p496_p0 }
  0x40   :  { %p499_p3 = pnand %p498_p2, %p492_p13 }
  0x42   :  { %502 = shalt.err (!%p499_p3)
}
  0x43   :  { %64 = dma.hbm_to_vmem [thread:$0]  %s694_s4, 256, %s616_s26, [#allocation9], %s535_s9, %s535_s9, %s536_s10  }
  0x44   :  { %525 = dma.done.wait [#allocation3], 128  }
  0x45   :  { %526 = vsyncadd [#allocation3], 4294967168 }
  0x46   :  { %527 = dma.done.wait [#allocation6], 384  }
  0x47   :  { %528 = vsyncadd [#allocation6], 4294966912 }
  0x48   :  { %529 = dma.done.wait [#allocation9], 256  }
  0x49   :  { %530 = vsyncadd [#allocation9], 4294967040  ;;  %v539_v0 = vmov 0.0   ;;  %vm540_vm0 = vmmov 0   ;;  %v399_v1 = vld [vmem:[#allocation5] sm:$0xff]   ;;  %v400_v2 = vld [vmem:[#allocation2] sm:$0xff]   ;;  %v85_v3 = vlaneseq }
  0x4a   :  { %366 = vmatprep.subr.bf16.mxu0 %v539_v0  ;;  %368 = vmatprep.mubr.msk.bf16.mxu0 %vm540_vm0, %v539_v0  ;;  %vm100_vm1 = vcmask 130048   ;;  %v80_v6 = vld [vmem:[%s692_s2] sm:$0xf]  ;;  %vm145_vm2 = vcmask 261120   ;;  %v401_v26 = vld [vmem:[#allocation7] sm:$0xff]   ;;  %v402_v27 = vld [vmem:[#allocation7 + $0x8] sm:$0xff]  }
  0x4b   :  { %372 = vmatprep.subr.bf16.mxu1 %v539_v0  ;;  %376 = vmatprep.mubr.msk.bf16.mxu1 %vm540_vm0, %v539_v0  ;;  %v659_v4 = vshrl.u32 %v85_v3, 7  ;;  %v173_v34 = vpack.c.bf16 %v80_v6, %v80_v6  ;;  %v403_v49 = vld [vmem:[#allocation8] sm:$0xff]   ;;  %v404_v50 = vld [vmem:[#allocation8 + $0x8] sm:$0xff]   ;;  %s541_s21 = smov [#allocation10]  }
  0x4c   :  { %367 = vmatpush3.bf16.msra.mxu0 %v399_v1  ;;  %373 = vmatpush3.bf16.msra.mxu1 %v401_v26  ;;  %v354_v62 = vld [vmem:[%s695_s5] ss:$0 sm:$0xff]  ;;  %s334_s22 = sshll.u32 %s541_s21, 4  ;;  %s335_s22 = int_to_ptr.vmem [resolvable:$true] %s334_s22 }
  0x4d   :  { %380 = vmatprep.subr.bf16.mxu0 %v539_v0  ;;  %v87_v5 = vsub.s32 0, %v659_v4  ;;  %374 = vmatprep.subr.bf16.mxu1 %v539_v0  ;;  %v175_v35 = vshrl.u32 %v173_v34, 16  ;;  %v183_v38 = vpack.i.b16 %v173_v34, %v173_v34  ;;  %v187_v39 = vsub.s32 1, %v659_v4  ;;  %s503_s23 = scalar_lea.vmem %s335_s22, 256  ;;  %p508_p5 = scmp.lt.s32.totalorder %s335_s22, %s335_s22 }
  0x4e   :  { %v197_v51 = vsub.s32 3, %v659_v4  ;;  %p504_p4 = scmp.ne.s32.totalorder %s335_s22, %s503_s23  ;;  %p509_p6 = scmp.lt.s32.totalorder %s503_s23, %s503_s23 }
  0x4f   :  { %369 = vmatmul.mubr.msk.bf16.vlgmr.msra.gmra.mrb[0].mxu0 %vm100_vm1, %v400_v2  ;;  %v88_v7 = vrot.slane %v80_v6, %v87_v5  ;;  %v176_v36 = vpack.i.b16 %v175_v35, %v175_v35  ;;  %v188_v44 = vrot.slane %v183_v38, %v187_v39 }
  0x50   :  { %384 = vmatprep.mubr.msk.bf16.mxu0 %vm540_vm0, %v539_v0  ;;  %375 = vmatpush3.bf16.msra.mxu1 %v402_v27  ;;  %v198_v52 = vrot.slane %v80_v6, %v197_v51  ;;  %p510_p7 = por %p509_p6, %p508_p5 }
  0x51   :  { %v181_v41 = vrot.slane %v176_v36, %v87_v5  ;;  %381 = vmatpush3.bf16.msra.mxu0 %v403_v49 }
  0x52   :  { %382 = vmatprep.subr.bf16.mxu0 %v539_v0  ;;  %p511_p8 = pnand %p510_p7, %p504_p4 }
  0x55   :  { %383 = vmatpush3.bf16.msra.mxu0 %v404_v50 }
 0x122   :  { %v138_v8 = vpop.f32.mrb[0].mxu0 }
 0x123   :  { %v139_v9 = vadd.f32 %v138_v8, %v88_v7  ;;  %v370_v10 = vpop.f32.mrb[1].mxu0 }
 0x124   :  { %v141_v11 = vpop.f32.mrb[2].mxu0 }
 0x125   :  { %v142_v12 = vadd.f32 %v141_v11, %v88_v7  ;;  %v371_v13 = vpop.f32.mrb[3].mxu0  ;;  %v146_v14 = vsel %vm145_vm2, %v139_v9, 0.0 }
 0x126   :  { %147 = vadd.xlane.f32.xlu0 %v146_v14 }
 0x127   :  { %v149_v15 = vsel %vm145_vm2, %v142_v12, 0.0 }
 0x12a   :  { %150 = vadd.xlane.f32.xlu0 %v149_v15 }
 0x1b3   :  { %v148_v16 = vpop.xlane.xlu0 %147 }
 0x1b4   :  { %v152_v17 = vmul.f32 0.03125, %v148_v16 }
 0x1b6   :  { %v154_v18 = vsub.f32 %v139_v9, %v152_v17 }
 0x1b7   :  { %v151_v19 = vpop.xlane.xlu0 %150 }
 0x1b8   :  { %v153_v20 = vmul.f32 0.03125, %v151_v19  ;;  %v156_v21 = vmul.f32 %v154_v18, %v154_v18 }
 0x1ba   :  { %v155_v22 = vsub.f32 %v142_v12, %v153_v20  ;;  %v158_v23 = vsel %vm145_vm2, %v156_v21, 0.0 }
 0x1bb   :  { %159 = vadd.xlane.f32.xlu1 %v158_v23 }
 0x1bc   :  { %v157_v24 = vmul.f32 %v155_v22, %v155_v22 }
 0x1be   :  { %v161_v25 = vsel %vm145_vm2, %v157_v24, 0.0 }
 0x1bf   :  { %162 = vadd.xlane.f32.xlu1 %v161_v25 }
 0x248   :  { %v160_v28 = vpop.xlane.xlu1 %159 }
 0x249   :  { %v164_v29 = vmul.f32 0.03125, %v160_v28 }
 0x24b   :  { %v166_v30 = vadd.f32 1e-05, %v164_v29 }
 0x24c   :  { %v163_v31 = vpop.xlane.xlu1 %162 }
 0x24d   :  { %v165_v32 = vmul.f32 0.03125, %v163_v31  ;;  %405 = vrsqrt.f32 %v166_v30 }
 0x24f   :  { %v167_v33 = vadd.f32 1e-05, %v165_v32 }
 0x251   :  { %407 = vrsqrt.f32 %v167_v33 }
 0x257   :  { %v406_v37 = vpop.eup %405 }
 0x258   :  { %v170_v42 = vmul.f32 %v406_v37, %v154_v18 }
 0x25b   :  { %v408_v40 = vpop.eup %407 }
 0x25c   :  { %v171_v43 = vmul.f32 %v408_v40, %v155_v22 }
 0x25e   :  { %v172_v45 = vpack.c.bf16 %v171_v43, %v170_v42 }
 0x260   :  { %v182_v46 = vmul.bf16 %v181_v41, %v172_v45 }
 0x262   :  { %v189_v47 = vadd.bf16 %v188_v44, %v182_v46 }
 0x264   :  { %409 = vtanh.bf16 %v189_v47 }
 0x26f   :  { %v410_v48 = vpop.eup %409 }
 0x270   :  { %377 = vmatmul.mubr.msk.bf16.vlgmr.msra.gmra.mrb[0].mxu1 %vm145_vm2, %v410_v48 }
 0x343   :  { %v248_v53 = vpop.f32.mrb[0].mxu1 }
 0x344   :  { %v249_v54 = vadd.f32 %v248_v53, %v198_v52  ;;  %v378_v55 = vpop.f32.mrb[1].mxu1 }
 0x345   :  { %v251_v56 = vpop.f32.mrb[2].mxu1 }
 0x346   :  { %v252_v57 = vadd.f32 %v251_v56, %v198_v52  ;;  %v379_v58 = vpop.f32.mrb[3].mxu1  ;;  %v255_v59 = vmax.f32 %v249_v54, 0.0 }
 0x348   :  { %v256_v60 = vmax.f32 %v252_v57, 0.0 }
 0x34a   :  { %v257_v61 = vpack.c.bf16 %v256_v60, %v255_v59 }
 0x34c   :  { %385 = vmatmul.mubr.msk.bf16.vlgmr.msra.gmra.mrb[4].mxu0 %vm145_vm2, %v257_v61 }
 0x41f   :  { %v318_v63 = vpop.f32.mrb[4].mxu0 }
 0x420   :  { %v319_v0 = vadd.f32 %v354_v62, %v318_v63  ;;  %v386_v1 = vpop.f32.mrb[5].mxu0 }
 0x421   :  { %v321_v2 = vpop.f32.mrb[6].mxu0 }
 0x422   :  { %411 = vtanh.f32 %v319_v0  ;;  %v322_v3 = vadd.f32 %v354_v62, %v321_v2  ;;  %v387_v4 = vpop.f32.mrb[7].mxu0 }
 0x424   :  { %413 = vtanh.f32 %v322_v3 }
 0x42c   :  { %v412_v5 = vpop.eup %411 }
 0x42d   :  { %327 = vst [vmem:[#allocation10] sm:$0xff] %v412_v5 }
 0x42e   :  { %v414_v6 = vpop.eup %413 }
 0x42f   :  { %328 = vst [vmem:[#allocation10 + $0x8] sm:$0xff] %v414_v6 }
 0x430   :  { %514 = shalt.err (!%p511_p8)
}
 0x431   :  { %s515_s26 = scalar_lea.hbm %s696_s6, 256 }
 0x432   :  { %p516_p9 = scmp.ne.s32.totalorder %s696_s6, %s515_s26  ;;  %p519_p10 = scmp.lt.u32.totalorder %s515_s26, %s696_s6 }
 0x434   :  { %p521_p11 = pnand %p519_p10, %p516_p9 }
 0x436   :  { %524 = shalt.err (!%p521_p11)
}
 0x437   :  { %s542_s7 = smov 128   ;;  %s543_s8 = smov 8  }
 0x438   :  { %340 = dma.vmem_to_hbm [thread:$0]  %s335_s22, 256, %s696_s6, [#allocation4], %s542_s7, %s542_s7, %s543_s8  }
 0x439   :  { %531 = dma.done.wait [#allocation4], 256  }
 0x43a   :  { %532 = vsyncadd [#allocation4], 4294967040 }
 0x43b   :  { %344 = vsyncpa [#allocation3], 1 }
 0x43c   :  { %345 = vsyncpa [#allocation6], 1 }
 0x43d   :  { %346 = vsyncpa [#allocation9], 1 }
 0x43e   :  { %347 = vsyncpa [#allocation4], 1 }

</bundles_post_ra>
